<compile_context>
chip_gen: v7x
topology: tpu7x:2x2x1
jax: 0.10.0
libtpu: 0.0.40
codegen_flags: <defaults>
</compile_context>

<pallas_src>
import functools
import math

import jax
import jax.numpy as jnp
from jax.experimental import pallas as pl
from jax.experimental.pallas import tpu as pltpu


def _round_up(n, m):
    return ((n + m - 1) // m) * m


def encoder_kernel(x_ref, wa_ref, ba_ref, w1_ref, b1_ref, o_ref, *, logit_thresh):
    """Fused Encoder forward for one batch tile.

    a   = x @ Wa + ba
    xg  = where(a > logit(thresh), x, 0)     # == x * (sigmoid(a) > thresh)
    out = relu(xg @ W1 + b1)
    """
    x = x_ref[...]                                               # (tb, Dp)

    # fca: Linear(D, D) on the MXU, f32 accumulation.
    a = jnp.dot(x, wa_ref[...], preferred_element_type=jnp.float32)
    a = a + ba_ref[...]                                          # (1, Dp) broadcast

    # Hard gate via logit-threshold select (single VPU op, no sigmoid/EUP).
    xg = jnp.where(a > logit_thresh, x, jnp.zeros_like(x))

    # fc1: Linear(D, H) on the MXU, f32 accumulation.
    h = jnp.dot(xg, w1_ref[...], preferred_element_type=jnp.float32)
    h = h + b1_ref[...]                                          # (1, Hp) broadcast

    o_ref[...] = jnp.maximum(h, 0.0).astype(o_ref.dtype)


def encoder_forward(x, wa, ba, w1, b1, thresh, *, tb=None, compute_dtype=None):
    """Fused Encoder forward.

    x:  (..., D) float32 (flattened to (B, D) like x.view(-1, inputt))
    wa: (D, D), ba: (1, D)  -- fca weights (in, out) layout
    w1: (D, H), b1: (1, H)  -- fc1 weights (in, out) layout
    thresh: python float gating threshold.
    """
    D = wa.shape[0]
    H = w1.shape[1]
    x = x.reshape(-1, D)                      # PyTorch x.view(-1, inputt)
    B = x.shape[0]

    # --- fold the threshold at trace time (strict '>' preserved by strict
    #     monotonicity of sigmoid; thresh outside (0,1) maps to +/-inf). ---
    thresh = float(thresh)
    if thresh <= 0.0:
        logit_t = -float("inf")               # gate always open
    elif thresh >= 1.0:
        logit_t = float("inf")                # gate always closed
    else:
        logit_t = math.log(thresh / (1.0 - thresh))

    # --- lane-dense padding: last dims to multiples of 128, batch to the
    #     chosen tile (zeros are inert end-to-end; sliced off afterwards). ---
    Dp = _round_up(D, 128)
    Hp = _round_up(H, 128)

    if tb is None:
        tb = min(512, max(8, B))              # one fat tile for small B
    tb = _round_up(tb, 8)                     # sublane multiple
    Bp = _round_up(max(B, tb), tb)

    if compute_dtype is None:
        compute_dtype = x.dtype

    xp = jnp.pad(x, ((0, Bp - B), (0, Dp - D))).astype(compute_dtype)
    wap = jnp.pad(wa, ((0, Dp - D), (0, Dp - D))).astype(compute_dtype)
    bap = jnp.pad(ba, ((0, 0), (0, Dp - D))).astype(jnp.float32)
    w1p = jnp.pad(w1, ((0, Dp - D), (0, Hp - H))).astype(compute_dtype)
    b1p = jnp.pad(b1, ((0, 0), (0, Hp - H))).astype(jnp.float32)

    grid = (Bp // tb,)
    kernel = functools.partial(encoder_kernel, logit_thresh=logit_t)

    out = pl.pallas_call(
        kernel,
        out_shape=jax.ShapeDtypeStruct((Bp, Hp), jnp.float32),
        grid_spec=pltpu.PrefetchScalarGridSpec(
            num_scalar_prefetch=0,
            grid=grid,
            in_specs=[
                # batch-tiled activations (lane-dense Dp)
                pl.BlockSpec((tb, Dp), lambda i: (i, 0)),
                # weights / biases: full blocks, DMA'd once, resident across
                # the whole grid (constant index_map).  For very large D/H on
                # v7x's 64 MiB VMEM, add an "arbitrary" K/N grid axis instead.
                pl.BlockSpec((Dp, Dp), lambda i: (0, 0)),
                pl.BlockSpec((1, Dp), lambda i: (0, 0)),
                pl.BlockSpec((Dp, Hp), lambda i: (0, 0)),
                pl.BlockSpec((1, Hp), lambda i: (0, 0)),
            ],
            out_specs=pl.BlockSpec((tb, Hp), lambda i: (i, 0)),
        ),
        compiler_params=pltpu.CompilerParams(
            dimension_semantics=("parallel",)),
    )(xp, wap, bap, w1p, b1p)

    return out[:B, :H]


def encoder_reference(x, wa, ba, w1, b1, thresh):
    x = x.reshape(-1, wa.shape[0])
    a = jax.nn.sigmoid(x @ wa + ba)
    gate = (a > thresh).astype(x.dtype)
    return jax.nn.relu((x * gate) @ w1 + b1)


if __name__ == "__main__":
    key = jax.random.PRNGKey(0)
    B, INPUTT, HIDDEN = 16, 32, 64      # small shapes: batch=16, input=32, hidden=64
    thresh = 0.5

    kx, kwa, kba, kw1, kb1 = jax.random.split(key, 5)
    # deterministic synthetic parameters (PyTorch-Linear-like uniform init)
    bound_a = 1.0 / jnp.sqrt(INPUTT)
    x = jax.random.normal(kx, (B, INPUTT), dtype=jnp.float32)
    wa = jax.random.uniform(kwa, (INPUTT, INPUTT), jnp.float32, -bound_a, bound_a)
    ba = jax.random.uniform(kba, (1, INPUTT), jnp.float32, -bound_a, bound_a)
    w1 = jax.random.uniform(kw1, (INPUTT, HIDDEN), jnp.float32, -bound_a, bound_a)
    b1 = jax.random.uniform(kb1, (1, HIDDEN), jnp.float32, -bound_a, bound_a)

    out = encoder_forward(x, wa, ba, w1, b1, thresh)
    out = jax.block_until_ready(out)

    ref = encoder_reference(x, wa, ba, w1, b1, thresh)
    assert out.shape == (B, HIDDEN), out.shape
    assert jnp.allclose(out, ref, atol=1e-5, rtol=1e-5)

    print("KERNEL_OK")
</pallas_src>

<mosaic_0001>
module attributes {stable_mosaic.version = 11 : i64} {
  func.func @encoder_kernel(%arg0: i32, %arg1: memref<16x128xf32, #tpu.memory_space<vmem>>, %arg2: memref<128x128xf32, #tpu.memory_space<vmem>>, %arg3: memref<1x128xf32, #tpu.memory_space<vmem>>, %arg4: memref<128x128xf32, #tpu.memory_space<vmem>>, %arg5: memref<1x128xf32, #tpu.memory_space<vmem>>, %arg6: memref<16x128xf32, #tpu.memory_space<vmem>>) attributes {dimension_semantics = [#tpu.dimension_semantics<parallel>], iteration_bounds = array<i64: 1>, scalar_prefetch = 0 : i64, scratch_operands = 0 : i64, tpu.core_type = #tpu.core_type<tc>, window_params = [{transform_indices = @transform_0, window_bounds = array<i64: 16, 128>}, {pipeline_mode = #tpu.pipeline_mode<synchronous>, transform_indices = @transform_1, window_bounds = array<i64: 128, 128>}, {pipeline_mode = #tpu.pipeline_mode<synchronous>, transform_indices = @transform_2, window_bounds = array<i64: 1, 128>}, {pipeline_mode = #tpu.pipeline_mode<synchronous>, transform_indices = @transform_3, window_bounds = array<i64: 128, 128>}, {pipeline_mode = #tpu.pipeline_mode<synchronous>, transform_indices = @transform_4, window_bounds = array<i64: 1, 128>}, {transform_indices = @transform_5, window_bounds = array<i64: 16, 128>}]} {
    %c0 = arith.constant 0 : index
    %c0_0 = arith.constant 0 : index
    %0 = vector.load %arg1[%c0, %c0_0] : memref<16x128xf32, #tpu.memory_space<vmem>>, vector<16x128xf32>
    %c0_1 = arith.constant 0 : index
    %c0_2 = arith.constant 0 : index
    %1 = vector.load %arg2[%c0_1, %c0_2] : memref<128x128xf32, #tpu.memory_space<vmem>>, vector<128x128xf32>
    %cst = arith.constant dense<0.000000e+00> : vector<16x128xf32>
    %2 = tpu.matmul %0, %1, %cst {dimension_numbers = #tpu.dot_dimension_numbers<[1], [0], [0], [1], [0, 0, 1, 1], [], []>} : vector<16x128xf32>, vector<128x128xf32>, vector<16x128xf32> -> vector<16x128xf32>
    %c0_3 = arith.constant 0 : index
    %c0_4 = arith.constant 0 : index
    %3 = vector.load %arg3[%c0_3, %c0_4] : memref<1x128xf32, #tpu.memory_space<vmem>>, vector<1x128xf32>
    %4 = vector.broadcast %3 : vector<1x128xf32> to vector<16x128xf32>
    %5 = arith.addf %2, %4 : vector<16x128xf32>
    %cst_5 = arith.constant 0.000000e+00 : f32
    %6 = vector.broadcast %cst_5 : f32 to vector<16x128xf32>
    %7 = arith.cmpf ogt, %5, %6 : vector<16x128xf32>
    %cst_6 = arith.constant 0.000000e+00 : f32
    %8 = vector.broadcast %cst_6 : f32 to vector<16x128xf32>
    %9 = arith.select %7, %0, %8 : vector<16x128xi1>, vector<16x128xf32>
    %c0_7 = arith.constant 0 : index
    %c0_8 = arith.constant 0 : index
    %10 = vector.load %arg4[%c0_7, %c0_8] : memref<128x128xf32, #tpu.memory_space<vmem>>, vector<128x128xf32>
    %cst_9 = arith.constant dense<0.000000e+00> : vector<16x128xf32>
    %11 = tpu.matmul %9, %10, %cst_9 {dimension_numbers = #tpu.dot_dimension_numbers<[1], [0], [0], [1], [0, 0, 1, 1], [], []>} : vector<16x128xf32>, vector<128x128xf32>, vector<16x128xf32> -> vector<16x128xf32>
    %c0_10 = arith.constant 0 : index
    %c0_11 = arith.constant 0 : index
    %12 = vector.load %arg5[%c0_10, %c0_11] : memref<1x128xf32, #tpu.memory_space<vmem>>, vector<1x128xf32>
    %13 = vector.broadcast %12 : vector<1x128xf32> to vector<16x128xf32>
    %14 = arith.addf %11, %13 : vector<16x128xf32>
    %cst_12 = arith.constant 0.000000e+00 : f32
    %15 = vector.broadcast %cst_12 : f32 to vector<16x128xf32>
    %16 = arith.maximumf %14, %15 : vector<16x128xf32>
    %c0_13 = arith.constant 0 : index
    %c0_14 = arith.constant 0 : index
    %17 = vector.load %arg6[%c0_13, %c0_14] : memref<16x128xf32, #tpu.memory_space<vmem>>, vector<16x128xf32>
    tpu.vector_store %arg6[%c0_13, %c0_14], %16 {strides = array<i32>} : memref<16x128xf32, #tpu.memory_space<vmem>>, vector<16x128xf32>,
    return
  }
  func.func @transform_0(%arg0: i32) -> (i32, i32) {
    %c0_i32 = arith.constant 0 : i32
    %c0_i32_0 = arith.constant 0 : i32
    return %arg0, %c0_i32 : i32, i32
  }
  func.func @transform_1(%arg0: i32) -> (i32, i32) {
    %c0_i32 = arith.constant 0 : i32
    %c0_i32_0 = arith.constant 0 : i32
    %c0_i32_1 = arith.constant 0 : i32
    return %c0_i32, %c0_i32_0 : i32, i32
  }
  func.func @transform_2(%arg0: i32) -> (i32, i32) {
    %c0_i32 = arith.constant 0 : i32
    %c0_i32_0 = arith.constant 0 : i32
    %c0_i32_1 = arith.constant 0 : i32
    return %c0_i32, %c0_i32_0 : i32, i32
  }
  func.func @transform_3(%arg0: i32) -> (i32, i32) {
    %c0_i32 = arith.constant 0 : i32
    %c0_i32_0 = arith.constant 0 : i32
    %c0_i32_1 = arith.constant 0 : i32
    return %c0_i32, %c0_i32_0 : i32, i32
  }
  func.func @transform_4(%arg0: i32) -> (i32, i32) {
    %c0_i32 = arith.constant 0 : i32
    %c0_i32_0 = arith.constant 0 : i32
    %c0_i32_1 = arith.constant 0 : i32
    return %c0_i32, %c0_i32_0 : i32, i32
  }
  func.func @transform_5(%arg0: i32) -> (i32, i32) {
    %c0_i32 = arith.constant 0 : i32
    %c0_i32_0 = arith.constant 0 : i32
    return %arg0, %c0_i32 : i32, i32
  }
}

</mosaic_0001>

<bundles_post_ra>
// kernel: tpu_custom_call.1
= control target key start
LH: loop header
LB: loop body
LE: loop exit
PB: predicated region body
PF: predicated region fallthrough
CT: control target
= control target key end

     0   :  { %10 = vsyncpa [#allocation3], 0  ;;  %s673_s0 = inlined_call_operand.hbm [shape: f32[16,128], index: 0, kind: input, shape index: {}]   ;;  %s674_s1 = inlined_call_operand.hbm [shape: f32[128,128], index: 1, kind: input, shape index: {}]   ;;  %s675_s2 = inlined_call_operand.vmem [shape: f32[1,128], index: 2, kind: input, shape index: {}]   ;;  %s676_s3 = inlined_call_operand.hbm [shape: f32[128,128], index: 3, kind: input, shape index: {}]   ;;  %s677_s4 = inlined_call_operand.vmem [shape: f32[1,128], index: 4, kind: input, shape index: {}]   ;;  %s678_s5 = inlined_call_operand.hbm [shape: f32[16,128], index: 5, kind: output, shape index: {}]  }
   0x1   :  { %11 = vsyncpa [#allocation6], 0 }
   0x2   :  { %12 = vsyncpa [#allocation4], 0  ;;  %s560_s18 = smov [#allocation5]   ;;  %s561_s20 = smov [#allocation2]  }
   0x3   :  { %s30_s19 = sshll.u32 %s560_s18, 4  ;;  %s18_s21 = sshll.u32 %s561_s20, 4  ;;  %s31_s19 = int_to_ptr.vmem [resolvable:$true] %s30_s19  ;;  %s596_s21 = int_to_ptr.vmem [resolvable:$true] %s18_s21 }
   0x4   :  { %s466_s24 = scalar_lea.hbm %s674_s1, 2048 }
   0x5   :  { %p467_p0 = scmp.ne.s32.totalorder %s674_s1, %s466_s24  ;;  %p470_p1 = scmp.lt.u32.totalorder %s466_s24, %s674_s1 }
   0x7   :  { %p472_p2 = pnand %p470_p1, %p467_p0 }
   0x9   :  { %475 = shalt.err (!%p472_p2)
}
   0xa   :  { %s476_s29 = scalar_lea.vmem %s31_s19, 2048  ;;  %p481_p4 = scmp.lt.s32.totalorder %s31_s19, %s31_s19 }
   0xb   :  { %p477_p3 = scmp.ne.s32.totalorder %s31_s19, %s476_s29  ;;  %p482_p5 = scmp.lt.s32.totalorder %s476_s29, %s476_s29 }
   0xd   :  { %p483_p6 = por %p482_p5, %p481_p4 }
   0xf   :  { %p484_p7 = pnand %p483_p6, %p477_p3 }
  0x11   :  { %487 = shalt.err (!%p484_p7)
}
  0x12   :  { %s562_s30 = smov 128   ;;  %s563_s6 = smov 8  }
  0x13   :  { %36 = dma.hbm_to_vmem [thread:$0]  %s674_s1, 2048, %s31_s19, [#allocation6], %s562_s30, %s562_s30, %s563_s6  }
  0x14   :  { %s488_s11 = scalar_lea.hbm %s673_s0, 256 }
  0x15   :  { %p489_p8 = scmp.ne.s32.totalorder %s673_s0, %s488_s11  ;;  %p492_p9 = scmp.lt.u32.totalorder %s488_s11, %s673_s0 }
  0x17   :  { %p494_p10 = pnand %p492_p9, %p489_p8 }
  0x19   :  { %497 = shalt.err (!%p494_p10)
}
  0x1a   :  { %s498_s16 = scalar_lea.vmem %s596_s21, 256  ;;  %p503_p12 = scmp.lt.s32.totalorder %s596_s21, %s596_s21 }
  0x1b   :  { %p499_p11 = scmp.ne.s32.totalorder %s596_s21, %s498_s16  ;;  %p504_p13 = scmp.lt.s32.totalorder %s498_s16, %s498_s16 }
  0x1d   :  { %p505_p0 = por %p504_p13, %p503_p12 }
  0x1f   :  { %p506_p1 = pnand %p505_p0, %p499_p11 }
  0x21   :  { %509 = shalt.err (!%p506_p1)
}
  0x22   :  { %24 = dma.hbm_to_vmem [thread:$0]  %s673_s0, 256, %s596_s21, [#allocation3], %s562_s30, %s562_s30, %s563_s6  }
  0x23   :  { %s564_s18 = smov [#allocation7]   ;;  %s510_s23 = scalar_lea.hbm %s676_s3, 2048 }
  0x24   :  { %s44_s19 = sshll.u32 %s564_s18, 4  ;;  %p511_p2 = scmp.ne.s32.totalorder %s676_s3, %s510_s23  ;;  %s45_s19 = int_to_ptr.vmem [resolvable:$true] %s44_s19 }
  0x25   :  { %p514_p3 = scmp.lt.u32.totalorder %s510_s23, %s676_s3 }
  0x27   :  { %p516_p4 = pnand %p514_p3, %p511_p2 }
  0x29   :  { %519 = shalt.err (!%p516_p4)
}
  0x2a   :  { %s520_s28 = scalar_lea.vmem %s45_s19, 2048  ;;  %p525_p6 = scmp.lt.s32.totalorder %s45_s19, %s45_s19 }
  0x2b   :  { %p521_p5 = scmp.ne.s32.totalorder %s45_s19, %s520_s28  ;;  %p526_p7 = scmp.lt.s32.totalorder %s520_s28, %s520_s28 }
  0x2d   :  { %p527_p8 = por %p526_p7, %p525_p6 }
  0x2f   :  { %p528_p9 = pnand %p527_p8, %p521_p5 }
  0x31   :  { %531 = shalt.err (!%p528_p9)
}
  0x32   :  { %50 = dma.hbm_to_vmem [thread:$0]  %s676_s3, 2048, %s45_s19, [#allocation6], %s562_s30, %s562_s30, %s563_s6  }
  0x33   :  { %554 = dma.done.wait [#allocation3], 256  }
  0x34   :  { %555 = vsyncadd [#allocation3], 4294967040 }
  0x35   :  { %556 = dma.done.wait [#allocation6], 4096  }
  0x36   :  { %557 = vsyncadd [#allocation6], 4294963200  ;;  %v64_v0 = vld [vmem:[#allocation5] sm:$0xff]  ;;  %v65_v1 = vld [vmem:[#allocation5 + $0x8] sm:$0xff]  ;;  %s565_s9 = smov [#allocation8]  }
  0x37   :  { %v66_v2 = vld [vmem:[#allocation5 + $0x10] sm:$0xff]  ;;  %v396_v3 = vpack.c.bf16 %v65_v1, %v64_v0  ;;  %v67_v4 = vld [vmem:[#allocation5 + $0x18] sm:$0xff]  ;;  %v68_v6 = vld [vmem:[#allocation5 + $0x20] sm:$0xff]  ;;  %s273_s10 = sshll.u32 %s565_s9, 4  ;;  %s274_s10 = int_to_ptr.vmem [resolvable:$true] %s273_s10 }
  0x38   :  { %v400_v5 = vpack.c.bf16 %v67_v4, %v66_v2  ;;  %v69_v7 = vld [vmem:[#allocation5 + $0x28] sm:$0xff]  ;;  %v70_v9 = vld [vmem:[#allocation5 + $0x30] sm:$0xff]  ;;  %v71_v10 = vld [vmem:[#allocation5 + $0x38] sm:$0xff]  ;;  %p537_p11 = scmp.lt.s32.totalorder %s274_s10, %s274_s10 }
  0x39   :  { %397 = vmatprep.subr.bf16.mxu0 %v396_v3  ;;  %v404_v8 = vpack.c.bf16 %v69_v7, %v68_v6  ;;  %v648_v11 = vld [vmem:[#allocation2] sm:$0xff]  ;;  %v166_v12 = vld [vmem:[#allocation7] sm:$0xff]  ;;  %v167_v13 = vld [vmem:[#allocation7 + $0x8] sm:$0xff]  ;;  %v408_v20 = vpack.c.bf16 %v71_v10, %v70_v9 }
  0x3a   :  { %399 = vmatpush3.bf16.msra.mxu0 %v396_v3  ;;  %358 = vmatprep.mubr.f32.mxu0 %v648_v11  ;;  %v168_v14 = vld [vmem:[#allocation7 + $0x10] sm:$0xff]  ;;  %v428_v15 = vpack.c.bf16 %v167_v13, %v166_v12  ;;  %v169_v16 = vld [vmem:[#allocation7 + $0x18] sm:$0xff]  ;;  %v170_v18 = vld [vmem:[#allocation7 + $0x20] sm:$0xff] }
  0x3b   :  { %401 = vmatprep.subr.bf16.mxu0 %v400_v5  ;;  %v432_v17 = vpack.c.bf16 %v169_v16, %v168_v14  ;;  %v171_v19 = vld [vmem:[#allocation7 + $0x28] sm:$0xff]  ;;  %v72_v21 = vld [vmem:[#allocation5 + $0x40] sm:$0xff]  ;;  %v172_v24 = vld [vmem:[#allocation7 + $0x30] sm:$0xff] }
  0x3c   :  { %429 = vmatprep.subr.bf16.mxu1 %v428_v15  ;;  %v73_v22 = vld [vmem:[#allocation5 + $0x48] sm:$0xff]  ;;  %v436_v23 = vpack.c.bf16 %v171_v19, %v170_v18  ;;  %v173_v25 = vld [vmem:[#allocation7 + $0x38] sm:$0xff]  ;;  %v74_v27 = vld [vmem:[#allocation5 + $0x50] sm:$0xff] }
  0x3d   :  { %431 = vmatpush3.bf16.msra.mxu1 %v428_v15  ;;  %v412_v26 = vpack.c.bf16 %v73_v22, %v72_v21  ;;  %v75_v28 = vld [vmem:[#allocation5 + $0x58] sm:$0xff]  ;;  %v440_v29 = vpack.c.bf16 %v173_v25, %v172_v24  ;;  %v174_v30 = vld [vmem:[#allocation7 + $0x40] sm:$0xff]  ;;  %v175_v31 = vld [vmem:[#allocation7 + $0x48] sm:$0xff] }
  0x3e   :  { %403 = vmatpush3.bf16.msra.mxu0 %v400_v5  ;;  %433 = vmatprep.subr.bf16.mxu1 %v432_v17  ;;  %v416_v32 = vpack.c.bf16 %v75_v28, %v74_v27  ;;  %v76_v33 = vld [vmem:[#allocation5 + $0x60] sm:$0xff]  ;;  %v77_v34 = vld [vmem:[#allocation5 + $0x68] sm:$0xff]  ;;  %v444_v35 = vpack.c.bf16 %v175_v31, %v174_v30  ;;  %v176_v36 = vld [vmem:[#allocation7 + $0x50] sm:$0xff] }
  0x3f   :  { %405 = vmatprep.subr.bf16.mxu0 %v404_v8  ;;  %v177_v37 = vld [vmem:[#allocation7 + $0x58] sm:$0xff]  ;;  %v420_v38 = vpack.c.bf16 %v77_v34, %v76_v33  ;;  %v78_v39 = vld [vmem:[#allocation5 + $0x70] sm:$0xff]  ;;  %v178_v42 = vld [vmem:[#allocation7 + $0x60] sm:$0xff] }
  0x40   :  { %v79_v40 = vld [vmem:[#allocation5 + $0x78] sm:$0xff]  ;;  %v448_v41 = vpack.c.bf16 %v177_v37, %v176_v36  ;;  %v179_v43 = vld [vmem:[#allocation7 + $0x68] sm:$0xff]  ;;  %v180_v47 = vld [vmem:[#allocation7 + $0x70] sm:$0xff] }
  0x41   :  { %435 = vmatpush3.bf16.msra.mxu1 %v432_v17  ;;  %v424_v44 = vpack.c.bf16 %v79_v40, %v78_v39  ;;  %v452_v45 = vpack.c.bf16 %v179_v43, %v178_v42  ;;  %v63_v46 = vld [vmem:[#allocation2 + $0x8] sm:$0xff]  ;;  %v286_v50 = vld [vmem:[%s675_s2] ss:$0 sm:$0xff]  ;;  %s532_s2 = scalar_lea.vmem %s274_s10, 256 }
  0x42   :  { %407 = vmatpush3.bf16.msra.mxu0 %v404_v8  ;;  %437 = vmatprep.subr.bf16.mxu1 %v436_v23  ;;  %v181_v48 = vld [vmem:[#allocation7 + $0x78] sm:$0xff]  ;;  %v287_v55 = vld [vmem:[%s677_s4] ss:$0 sm:$0xff]  ;;  %p533_p10 = scmp.ne.s32.totalorder %s274_s10, %s532_s2  ;;  %p538_p12 = scmp.lt.s32.totalorder %s532_s2, %s532_s2 }
  0x43   :  { %409 = vmatprep.subr.bf16.mxu0 %v408_v20  ;;  %v456_v49 = vpack.c.bf16 %v181_v48, %v180_v47 }
  0x44   :  { %p539_p13 = por %p538_p12, %p537_p11 }
  0x45   :  { %439 = vmatpush3.bf16.msra.mxu1 %v436_v23 }
  0x46   :  { %411 = vmatpush3.bf16.msra.mxu0 %v408_v20  ;;  %441 = vmatprep.subr.bf16.mxu1 %v440_v29  ;;  %p540_p0 = pnand %p539_p13, %p533_p10 }
  0x47   :  { %413 = vmatprep.subr.bf16.mxu0 %v412_v26 }
  0x49   :  { %443 = vmatpush3.bf16.msra.mxu1 %v440_v29 }
  0x4a   :  { %415 = vmatpush3.bf16.msra.mxu0 %v412_v26  ;;  %445 = vmatprep.subr.bf16.mxu1 %v444_v35 }
  0x4b   :  { %417 = vmatprep.subr.bf16.mxu0 %v416_v32 }
  0x4d   :  { %447 = vmatpush3.bf16.msra.mxu1 %v444_v35 }
  0x4e   :  { %419 = vmatpush3.bf16.msra.mxu0 %v416_v32  ;;  %449 = vmatprep.subr.bf16.mxu1 %v448_v41 }
  0x4f   :  { %421 = vmatprep.subr.bf16.mxu0 %v420_v38 }
  0x51   :  { %451 = vmatpush3.bf16.msra.mxu1 %v448_v41 }
  0x52   :  { %423 = vmatpush3.bf16.msra.mxu0 %v420_v38  ;;  %453 = vmatprep.subr.bf16.mxu1 %v452_v45 }
  0x53   :  { %425 = vmatprep.subr.bf16.mxu0 %v424_v44 }
  0x55   :  { %455 = vmatpush3.bf16.msra.mxu1 %v452_v45 }
  0x56   :  { %427 = vmatpush3.bf16.msra.mxu0 %v424_v44  ;;  %457 = vmatprep.subr.bf16.mxu1 %v456_v49 }
  0x59   :  { %359 = vmatmul.mubr.f32.vlgmr.msra.gmra.mrb[0].mxu0 %v63_v46  ;;  %459 = vmatpush3.bf16.msra.mxu1 %v456_v49 }
 0x12c   :  { %v360_v51 = vpop.f32.mrb[0].mxu0 }
 0x12d   :  { %v159_v52 = vadd.f32 %v360_v51, %v286_v50  ;;  %v153_v53 = vpop.f32.mrb[1].mxu0 }
 0x12e   :  { %v154_v54 = vadd.f32 %v286_v50, %v153_v53 }
 0x12f   :  { %vm163_vm1 = vcmp.gt.f32.partialorder %v159_v52, 0.0 }
 0x130   :  { %vm162_vm0 = vcmp.gt.f32.partialorder %v154_v54, 0.0 }
 0x131   :  { %393 = vmatprep.mubr.msk.f32.mxu1 %vm162_vm0, %v648_v11 }
 0x132   :  { %394 = vmatmul.mubr.msk.f32.vlgmr.msra.gmra.mrb[0].mxu1 %vm163_vm1, %v63_v46 }
 0x205   :  { %v395_v56 = vpop.f32.mrb[0].mxu1 }
 0x206   :  { %v261_v57 = vadd.f32 %v395_v56, %v287_v55  ;;  %v255_v58 = vpop.f32.mrb[1].mxu1 }
 0x207   :  { %v256_v59 = vadd.f32 %v287_v55, %v255_v58 }
 0x208   :  { %v265_v60 = vmax.f32 %v261_v57, 0.0 }
 0x209   :  { %v264_v61 = vmax.f32 %v256_v59, 0.0 }
 0x20a   :  { %267 = vst [vmem:[#allocation8 + $0x8] sm:$0xff] %v265_v60 }
 0x20b   :  { %266 = vst [vmem:[#allocation8] sm:$0xff] %v264_v61 }
 0x20c   :  { %543 = shalt.err (!%p540_p0)
}
 0x20d   :  { %s544_s12 = scalar_lea.hbm %s678_s5, 256 }
 0x20e   :  { %p545_p1 = scmp.ne.s32.totalorder %s678_s5, %s544_s12  ;;  %p548_p2 = scmp.lt.u32.totalorder %s544_s12, %s678_s5 }
 0x210   :  { %p550_p3 = pnand %p548_p2, %p545_p1 }
 0x212   :  { %553 = shalt.err (!%p550_p3)
}
 0x213   :  { %279 = dma.vmem_to_hbm [thread:$0]  %s274_s10, 256, %s678_s5, [#allocation4], %s562_s30, %s562_s30, %s563_s6  }
 0x214   :  { %558 = dma.done.wait [#allocation4], 256  }
 0x215   :  { %559 = vsyncadd [#allocation4], 4294967040 }
 0x216   :  { %283 = vsyncpa [#allocation3], 1 }
 0x217   :  { %284 = vsyncpa [#allocation6], 1 }
 0x218   :  { %285 = vsyncpa [#allocation4], 1 }

</bundles_post_ra>
